<compile_context>
chip_gen: v7x
topology: tpu7x:2x2x1
jax: 0.10.0
libtpu: 0.0.40
codegen_flags: <defaults>
</compile_context>

<pallas_src>
import functools

import jax
import jax.numpy as jnp
import numpy as np
from jax.experimental import pallas as pl
from jax.experimental.pallas import tpu as pltpu


def _dino_loss_kernel(params_ref,        # SMEM (1,): [1 / teacher_temp]
                      student_ref,       # VMEM (TB, D)    crop v, row block b
                      teacher_ref,       # VMEM (2, TB, D) both teacher views, row block b
                      center_ref,        # VMEM (1, D)
                      loss_part_ref,     # VMEM (1, 1)     per-row-block partial loss
                      center_part_ref,   # VMEM (1, D)     per-row-block teacher column sum
                      q0_scr,            # VMEM (TB, D)    teacher softmax, view 0
                      qsum_scr,          # VMEM (TB, D)    view0 + view1 softmax
                      *, batch, inv_student_temp):
    v = pl.program_id(1)
    inv_batch = 1.0 / float(batch)

    # Teacher softmax computed once per row block (v == 0) and reused for
    # every student crop of that row block.
    @pl.when(v == 0)
    def _teacher():
        teacher = teacher_ref[...].astype(jnp.float32)           # (2, TB, D)
        center = center_ref[...].astype(jnp.float32)             # (1, D)
        inv_tt = params_ref[0]
        t = (teacher - center) * inv_tt
        t = t - jnp.max(t, axis=-1, keepdims=True)
        t_exp = jnp.exp(t)
        q = t_exp * pl.reciprocal(jnp.sum(t_exp, axis=-1, keepdims=True),
                                  approx=False)
        q0 = q[0]
        q0_scr[...] = q0
        qsum_scr[...] = q0 + q[1]
        # Raw-teacher column sum for the center EMA; the row-direction
        # reduction is offloaded to the otherwise idle MXU.
        t_pair = teacher[0] + teacher[1]                          # (TB, D)
        ones_row = jnp.ones((1, t_pair.shape[0]), jnp.float32)
        center_part_ref[...] = jnp.dot(ones_row, t_pair,
                                       preferred_element_type=jnp.float32)
        loss_part_ref[...] = jnp.zeros_like(loss_part_ref)

    # Student log-softmax pieces for this (crop, row-block) tile.
    student = student_ref[...].astype(jnp.float32)               # (TB, D)
    s_shift = student * inv_student_temp
    s_shift = s_shift - jnp.max(s_shift, axis=-1, keepdims=True)
    lse = jnp.log(jnp.sum(jnp.exp(s_shift), axis=-1, keepdims=True))   # (TB, 1)

    # sum_d(-q * log_softmax(s)) == lse - sum_d(q * s_shift)   (sum_d q == 1)
    @pl.when(v >= 2)   # local crop: both teacher views contribute (q0 + q1)
    def _local_crop():
        row = 2.0 * lse - jnp.sum(qsum_scr[...] * s_shift, axis=-1, keepdims=True)
        loss_part_ref[...] += jnp.sum(row, axis=0, keepdims=True) * inv_batch

    @pl.when(v == 0)   # global crop 0: opposite teacher view q1 = qsum - q0
    def _global_crop0():
        q1 = qsum_scr[...] - q0_scr[...]
        row = lse - jnp.sum(q1 * s_shift, axis=-1, keepdims=True)
        loss_part_ref[...] += jnp.sum(row, axis=0, keepdims=True) * inv_batch

    @pl.when(v == 1)   # global crop 1: opposite teacher view is q0
    def _global_crop1():
        row = lse - jnp.sum(q0_scr[...] * s_shift, axis=-1, keepdims=True)
        loss_part_ref[...] += jnp.sum(row, axis=0, keepdims=True) * inv_batch


def _vmem_capacity_bytes():
    """Physical VMEM per TensorCore (128 MiB v5e/v6e, 64 MiB v7x)."""
    cap = 128 * 1024 * 1024
    try:
        info = pltpu.get_tpu_info()
        cap = int(getattr(info, "vmem_capacity_bytes", cap) or cap)
    except Exception:
        pass
    return cap


def _pick_row_tile(batch, out_dim, in_itemsize, vmem_cap):
    """Rows per (TB, D) tile, sized from the per-generation VMEM capacity.

    Declared VMEM grows ~linearly in TB:
      student input  (double-buffered)      : 2 * TB*D*isz
      teacher input  (2 views, dbl-buffered): 4 * TB*D*isz
      q0 / (q0+q1) f32 scratch              : 2 * TB*D*4
    plus ~4 f32 TB*D planes of compiler temporaries (softmax intermediates),
    so we budget ~(6*isz + 6*4) bytes per row-per-feature against 80% of
    physical VMEM (leaves headroom on v7x's 64 MiB part).
    """
    bytes_per_row = out_dim * (6 * in_itemsize + 6 * 4)
    budget = int(vmem_cap * 0.80)
    align = 16 if in_itemsize < 4 else 8        # bf16 sublane packing
    cap_rows = max(align, budget // max(1, bytes_per_row))
    if batch <= cap_rows:
        return batch                            # full-dim block is always legal
    start = (min(cap_rows, batch) // align) * align
    for cand in range(start, 0, -align):
        if batch % cand == 0:
            return cand
    return batch


@functools.partial(
    jax.jit,
    static_argnames=("ncrops", "batch", "tb", "inv_student_temp",
                     "center_momentum", "vmem_limit_bytes"))
def _dino_loss_fwd(student3, teacher3, center, params, *, ncrops, batch, tb,
                   inv_student_temp, center_momentum, vmem_limit_bytes):
    out_dim = student3.shape[-1]
    n_row_blocks = batch // tb
    n_terms = 2 * (ncrops - 1)

    kernel = functools.partial(
        _dino_loss_kernel, batch=batch, inv_student_temp=inv_student_temp)

    loss_parts, center_parts = pl.pallas_call(
        kernel,
        grid=(n_row_blocks, ncrops),
        in_specs=[
            pl.BlockSpec(memory_space=pltpu.MemorySpace.SMEM),             # params
            pl.BlockSpec((None, tb, out_dim), lambda b, v: (v, b, 0)),     # student
            pl.BlockSpec((2, tb, out_dim), lambda b, v: (0, b, 0)),        # teacher
            pl.BlockSpec((1, out_dim), lambda b, v: (0, 0)),               # center
        ],
        out_specs=(
            pl.BlockSpec((None, 1, 1), lambda b, v: (b, 0, 0)),            # loss partials
            pl.BlockSpec((None, 1, out_dim), lambda b, v: (b, 0, 0)),      # center partials
        ),
        out_shape=(
            jax.ShapeDtypeStruct((n_row_blocks, 1, 1), jnp.float32),
            jax.ShapeDtypeStruct((n_row_blocks, 1, out_dim), jnp.float32),
        ),
        scratch_shapes=[
            pltpu.VMEM((tb, out_dim), jnp.float32),   # q0
            pltpu.VMEM((tb, out_dim), jnp.float32),   # q0 + q1
        ],
        compiler_params=pltpu.CompilerParams(
            dimension_semantics=("parallel", "arbitrary"),
            vmem_limit_bytes=vmem_limit_bytes),
    )(params, student3, teacher3, center)

    # Tiny final reductions + center EMA in plain JAX (lets the row-block
    # grid axis stay "parallel" for the v7x second TensorCore).
    loss = jnp.sum(loss_parts) * (1.0 / float(n_terms))
    # TODO(synk): dist.all_reduce / dist.get_world_size for the center update
    # have no single-chip equivalent here; world_size is taken as 1.
    batch_center = jnp.sum(center_parts, axis=0) * (1.0 / float(2 * batch))  # (1, D)
    new_center = (center.astype(jnp.float32) * center_momentum
                  + batch_center * (1.0 - center_momentum))
    return loss, new_center


class DINOLossPallas:
    """JAX/Pallas port of the PyTorch DINOLoss module (forward pass)."""

    def __init__(self, out_dim, ncrops, warmup_teacher_temp, teacher_temp,
                 warmup_teacher_temp_epochs, nepochs,
                 student_temp=0.1, center_momentum=0.9):
        self.out_dim = out_dim
        self.ncrops = ncrops
        self.student_temp = float(student_temp)
        self.center_momentum = float(center_momentum)
        self.center = jnp.zeros((1, out_dim), jnp.float32)
        self.teacher_temp_schedule = np.concatenate((
            np.linspace(warmup_teacher_temp, teacher_temp,
                        warmup_teacher_temp_epochs),
            np.ones(nepochs - warmup_teacher_temp_epochs) * teacher_temp,
        ))

    def __call__(self, student_output, teacher_output, epoch):
        teacher_temp = float(self.teacher_temp_schedule[epoch])
        n_teacher_rows, out_dim = teacher_output.shape
        batch = n_teacher_rows // 2
        assert n_teacher_rows == 2 * batch
        assert student_output.shape == (self.ncrops * batch, out_dim)

        # Inputs may be bf16 in HBM (kernel upcasts in-register); tile sizing
        # is generation-aware (v5e/v6e 128 MiB vs v7x 64 MiB VMEM).
        vmem_cap = _vmem_capacity_bytes()
        in_itemsize = jnp.dtype(student_output.dtype).itemsize
        tb = _pick_row_tile(batch, out_dim, in_itemsize, vmem_cap)

        student3 = student_output.reshape(self.ncrops, batch, out_dim)
        teacher3 = teacher_output.reshape(2, batch, out_dim)
        # Dynamic SMEM scalar: teacher-temp warmup does not cause a recompile.
        params = jnp.array([1.0 / teacher_temp], jnp.float32)

        loss, new_center = _dino_loss_fwd(
            student3, teacher3, self.center, params,
            ncrops=self.ncrops, batch=batch, tb=tb,
            inv_student_temp=1.0 / self.student_temp,
            center_momentum=self.center_momentum,
            vmem_limit_bytes=int(vmem_cap * 0.85))

        # TODO(synk): Python-side buffer mutation is not functional under
        # jax.jit/scan; thread new_center explicitly in real training code.
        self.center = new_center
        return loss


def _reference(student_output, teacher_output, center, ncrops,
               student_temp, teacher_temp, center_momentum):
    """Pure-JAX reference for correctness checking."""
    batch = teacher_output.shape[0] // 2
    s = student_output / student_temp
    student_chunks = [s[v * batch:(v + 1) * batch] for v in range(ncrops)]
    q = jax.nn.softmax((teacher_output - center) / teacher_temp, axis=-1)
    teacher_chunks = [q[i * batch:(i + 1) * batch] for i in range(2)]
    total, n_terms = 0.0, 0
    for iq, qc in enumerate(teacher_chunks):
        for v in range(ncrops):
            if v == iq:
                continue
            loss = jnp.sum(-qc * jax.nn.log_softmax(student_chunks[v], axis=-1),
                           axis=-1)
            total = total + jnp.mean(loss)
            n_terms += 1
    total = total / n_terms
    batch_center = (jnp.sum(teacher_output, axis=0, keepdims=True)
                    / teacher_output.shape[0])
    new_center = center * center_momentum + batch_center * (1 - center_momentum)
    return total, new_center


if __name__ == "__main__":
    out_dim = 128
    ncrops = 4
    batch = 8
    epoch = 3

    loss_mod = DINOLossPallas(
        out_dim=out_dim, ncrops=ncrops,
        warmup_teacher_temp=0.04, teacher_temp=0.07,
        warmup_teacher_temp_epochs=10, nepochs=100,
        student_temp=0.1, center_momentum=0.9,
    )

    key = jax.random.PRNGKey(0)
    k1, k2 = jax.random.split(key)
    student_output = jax.random.normal(k1, (ncrops * batch, out_dim), jnp.float32)
    teacher_output = jax.random.normal(k2, (2 * batch, out_dim), jnp.float32)

    center_before = loss_mod.center
    loss = loss_mod(student_output, teacher_output, epoch)
    loss = jax.block_until_ready(loss)
    new_center = jax.block_until_ready(loss_mod.center)

    ref_loss, ref_center = _reference(
        student_output, teacher_output, center_before, ncrops,
        loss_mod.student_temp,
        float(loss_mod.teacher_temp_schedule[epoch]),
        loss_mod.center_momentum,
    )
    assert jnp.allclose(loss, ref_loss, atol=1e-4, rtol=1e-4), (loss, ref_loss)
    assert jnp.allclose(new_center, ref_center, atol=1e-5, rtol=1e-5)

    print("KERNEL_OK")
</pallas_src>

<mosaic_0001>
module attributes {stable_mosaic.version = 11 : i64} {
  func.func @_dino_loss_kernel(%arg0: i32, %arg1: i32, %arg2: memref<1xf32, #tpu.memory_space<smem>>, %arg3: memref<1x8x128xf32, #tpu.memory_space<vmem>>, %arg4: memref<2x8x128xf32, #tpu.memory_space<vmem>>, %arg5: memref<1x128xf32, #tpu.memory_space<vmem>>, %arg6: memref<1x1x1xf32, #tpu.memory_space<vmem>>, %arg7: memref<1x1x128xf32, #tpu.memory_space<vmem>>, %arg8: memref<8x128xf32, #tpu.memory_space<vmem>>, %arg9: memref<8x128xf32, #tpu.memory_space<vmem>>) attributes {dimension_semantics = [#tpu.dimension_semantics<parallel>, #tpu.dimension_semantics<arbitrary>], iteration_bounds = array<i64: 1, 4>, scalar_prefetch = 0 : i64, scratch_operands = 2 : i64, tpu.core_type = #tpu.core_type<tc>, window_params = [{transform_indices = @transform_0, window_bounds = array<i64: 1>}, {transform_indices = @transform_1, window_bounds = array<i64: 1, 8, 128>}, {transform_indices = @transform_2, window_bounds = array<i64: 2, 8, 128>}, {pipeline_mode = #tpu.pipeline_mode<synchronous>, transform_indices = @transform_3, window_bounds = array<i64: 1, 128>}, {transform_indices = @transform_4, window_bounds = array<i64: 1, 1, 1>}, {transform_indices = @transform_5, window_bounds = array<i64: 1, 1, 128>}]} {
    %c0_i32 = arith.constant 0 : i32
    %0 = arith.cmpi eq, %arg1, %c0_i32 : i32
    %1 = arith.extui %0 : i1 to i32
    %c0_i32_0 = arith.constant 0 : i32
    %2 = arith.cmpi ne, %1, %c0_i32_0 : i32
    scf.if %2 {
      %c0_9 = arith.constant 0 : index
      %c0_10 = arith.constant 0 : index
      %c0_11 = arith.constant 0 : index
      %24 = vector.load %arg4[%c0_9, %c0_10, %c0_11] : memref<2x8x128xf32, #tpu.memory_space<vmem>>, vector<2x8x128xf32>
      %c0_12 = arith.constant 0 : index
      %c0_13 = arith.constant 0 : index
      %25 = vector.load %arg5[%c0_12, %c0_13] : memref<1x128xf32, #tpu.memory_space<vmem>>, vector<1x128xf32>
      %c0_14 = arith.constant 0 : index
      %26 = memref.load %arg2[%c0_14] : memref<1xf32, #tpu.memory_space<smem>>
      %27 = vector.shape_cast %25 : vector<1x128xf32> to vector<1x1x128xf32>
      %28 = vector.broadcast %27 : vector<1x1x128xf32> to vector<2x8x128xf32>
      %29 = arith.subf %24, %28 : vector<2x8x128xf32>
      %30 = vector.broadcast %26 : f32 to vector<2x8x128xf32>
      %31 = arith.mulf %29, %30 : vector<2x8x128xf32>
      %cst_15 = arith.constant dense<0xFF800000> : vector<2x8xf32>
      %32 = vector.multi_reduction <maximumf>, %31, %cst_15 [2] : vector<2x8x128xf32> to vector<2x8xf32>
      %33 = vector.shape_cast %32 : vector<2x8xf32> to vector<2x8x1xf32>
      %34 = vector.broadcast %33 : vector<2x8x1xf32> to vector<2x8x128xf32>
      %35 = arith.subf %31, %34 : vector<2x8x128xf32>
      %36 = math.exp %35 : vector<2x8x128xf32>
      %cst_16 = arith.constant dense<0.000000e+00> : vector<2x8xf32>
      %37 = vector.multi_reduction <add>, %36, %cst_16 [2] : vector<2x8x128xf32> to vector<2x8xf32>
      %38 = vector.shape_cast %37 : vector<2x8xf32> to vector<2x8x1xf32>
      %39 = tpu.reciprocal %38 : vector<2x8x1xf32> -> vector<2x8x1xf32>
      %40 = vector.broadcast %39 : vector<2x8x1xf32> to vector<2x8x128xf32>
      %41 = arith.mulf %36, %40 : vector<2x8x128xf32>
      %42 = vector.extract_strided_slice %41 {offsets = [0, 0, 0], sizes = [1, 8, 128], strides = [1, 1, 1]} : vector<2x8x128xf32> to vector<1x8x128xf32>
      %43 = vector.shape_cast %42 : vector<1x8x128xf32> to vector<8x128xf32>
      %c0_17 = arith.constant 0 : index
      %c0_18 = arith.constant 0 : index
      %44 = vector.load %arg8[%c0_17, %c0_18] : memref<8x128xf32, #tpu.memory_space<vmem>>, vector<8x128xf32>
      tpu.vector_store %arg8[%c0_17, %c0_18], %43 {strides = array<i32>} : memref<8x128xf32, #tpu.memory_space<vmem>>, vector<8x128xf32>,
      %45 = vector.extract_strided_slice %41 {offsets = [1, 0, 0], sizes = [1, 8, 128], strides = [1, 1, 1]} : vector<2x8x128xf32> to vector<1x8x128xf32>
      %46 = vector.shape_cast %45 : vector<1x8x128xf32> to vector<8x128xf32>
      %47 = arith.addf %43, %46 : vector<8x128xf32>
      %c0_19 = arith.constant 0 : index
      %c0_20 = arith.constant 0 : index
      %48 = vector.load %arg9[%c0_19, %c0_20] : memref<8x128xf32, #tpu.memory_space<vmem>>, vector<8x128xf32>
      tpu.vector_store %arg9[%c0_19, %c0_20], %47 {strides = array<i32>} : memref<8x128xf32, #tpu.memory_space<vmem>>, vector<8x128xf32>,
      %49 = vector.extract_strided_slice %24 {offsets = [0, 0, 0], sizes = [1, 8, 128], strides = [1, 1, 1]} : vector<2x8x128xf32> to vector<1x8x128xf32>
      %50 = vector.shape_cast %49 : vector<1x8x128xf32> to vector<8x128xf32>
      %51 = vector.extract_strided_slice %24 {offsets = [1, 0, 0], sizes = [1, 8, 128], strides = [1, 1, 1]} : vector<2x8x128xf32> to vector<1x8x128xf32>
      %52 = vector.shape_cast %51 : vector<1x8x128xf32> to vector<8x128xf32>
      %53 = arith.addf %50, %52 : vector<8x128xf32>
      %cst_21 = arith.constant 1.000000e+00 : f32
      %54 = vector.broadcast %cst_21 : f32 to vector<1x8xf32>
      %cst_22 = arith.constant dense<0.000000e+00> : vector<1x128xf32>
      %55 = tpu.matmul %54, %53, %cst_22 {dimension_numbers = #tpu.dot_dimension_numbers<[1], [0], [0], [1], [0, 0, 1, 1], [], []>} : vector<1x8xf32>, vector<8x128xf32>, vector<1x128xf32> -> vector<1x128xf32>
      %c0_23 = arith.constant 0 : index
      %c0_24 = arith.constant 0 : index
      %c0_25 = arith.constant 0 : index
      %56 = vector.load %arg7[%c0_23, %c0_24, %c0_25] : memref<1x1x128xf32, #tpu.memory_space<vmem>>, vector<1x1x128xf32>
      %57 = vector.shape_cast %56 : vector<1x1x128xf32> to vector<1x128xf32>
      %58 = vector.shape_cast %55 : vector<1x128xf32> to vector<1x1x128xf32>
      tpu.vector_store %arg7[%c0_23, %c0_24, %c0_25], %58 {strides = array<i32>} : memref<1x1x128xf32, #tpu.memory_space<vmem>>, vector<1x1x128xf32>,
      %cst_26 = arith.constant 0.000000e+00 : f32
      %59 = vector.broadcast %cst_26 : f32 to vector<1x1xf32>
      %c0_27 = arith.constant 0 : index
      %c0_28 = arith.constant 0 : index
      %c0_29 = arith.constant 0 : index
      %60 = vector.load %arg6[%c0_27, %c0_28, %c0_29] : memref<1x1x1xf32, #tpu.memory_space<vmem>>, vector<1x1x1xf32>
      %61 = vector.shape_cast %60 : vector<1x1x1xf32> to vector<1x1xf32>
      %62 = vector.shape_cast %59 : vector<1x1xf32> to vector<1x1x1xf32>
      tpu.vector_store %arg6[%c0_27, %c0_28, %c0_29], %62 {strides = array<i32>} : memref<1x1x1xf32, #tpu.memory_space<vmem>>, vector<1x1x1xf32>,
    } else {
    }
    %c0 = arith.constant 0 : index
    %c0_1 = arith.constant 0 : index
    %c0_2 = arith.constant 0 : index
    %3 = vector.load %arg3[%c0, %c0_1, %c0_2] : memref<1x8x128xf32, #tpu.memory_space<vmem>>, vector<1x8x128xf32>
    %4 = vector.shape_cast %3 : vector<1x8x128xf32> to vector<8x128xf32>
    %cst = arith.constant 1.000000e+01 : f32
    %5 = vector.broadcast %cst : f32 to vector<8x128xf32>
    %6 = arith.mulf %4, %5 : vector<8x128xf32>
    %cst_3 = arith.constant dense<0xFF800000> : vector<8xf32>
    %7 = vector.multi_reduction <maximumf>, %6, %cst_3 [1] : vector<8x128xf32> to vector<8xf32>
    %8 = vector.shape_cast %7 : vector<8xf32> to vector<8x1xf32>
    %9 = vector.broadcast %8 : vector<8x1xf32> to vector<8x128xf32>
    %10 = arith.subf %6, %9 : vector<8x128xf32>
    %11 = math.exp %10 : vector<8x128xf32>
    %cst_4 = arith.constant dense<0.000000e+00> : vector<8xf32>
    %12 = vector.multi_reduction <add>, %11, %cst_4 [1] : vector<8x128xf32> to vector<8xf32>
    %13 = vector.shape_cast %12 : vector<8xf32> to vector<8x1xf32>
    %14 = math.log %13 : vector<8x1xf32>
    %c2_i32 = arith.constant 2 : i32
    %15 = arith.cmpi sge, %arg1, %c2_i32 : i32
    %16 = arith.extui %15 : i1 to i32
    %c0_i32_5 = arith.constant 0 : i32
    %17 = arith.cmpi ne, %16, %c0_i32_5 : i32
    scf.if %17 {
      %cst_9 = arith.constant 2.000000e+00 : f32
      %24 = vector.broadcast %cst_9 : f32 to vector<8x1xf32>
      %25 = arith.mulf %24, %14 : vector<8x1xf32>
      %c0_10 = arith.constant 0 : index
      %c0_11 = arith.constant 0 : index
      %26 = vector.load %arg9[%c0_10, %c0_11] : memref<8x128xf32, #tpu.memory_space<vmem>>, vector<8x128xf32>
      %27 = arith.mulf %26, %10 : vector<8x128xf32>
      %cst_12 = arith.constant dense<0.000000e+00> : vector<8xf32>
      %28 = vector.multi_reduction <add>, %27, %cst_12 [1] : vector<8x128xf32> to vector<8xf32>
      %29 = vector.shape_cast %28 : vector<8xf32> to vector<8x1xf32>
      %30 = arith.subf %25, %29 : vector<8x1xf32>
      %c0_13 = arith.constant 0 : index
      %c0_14 = arith.constant 0 : index
      %c0_15 = arith.constant 0 : index
      %31 = vector.load %arg6[%c0_13, %c0_14, %c0_15] : memref<1x1x1xf32, #tpu.memory_space<vmem>>, vector<1x1x1xf32>
      %32 = vector.shape_cast %31 : vector<1x1x1xf32> to vector<1x1xf32>
      %cst_16 = arith.constant dense<0.000000e+00> : vector<1xf32>
      %33 = vector.multi_reduction <add>, %30, %cst_16 [0] : vector<8x1xf32> to vector<1xf32>
      %34 = vector.shape_cast %33 : vector<1xf32> to vector<1x1xf32>
      %cst_17 = arith.constant 1.250000e-01 : f32
      %35 = vector.broadcast %cst_17 : f32 to vector<1x1xf32>
      %36 = arith.mulf %34, %35 : vector<1x1xf32>
      %37 = arith.addf %32, %36 : vector<1x1xf32>
      %c0_18 = arith.constant 0 : index
      %c0_19 = arith.constant 0 : index
      %c0_20 = arith.constant 0 : index
      %38 = vector.load %arg6[%c0_18, %c0_19, %c0_20] : memref<1x1x1xf32, #tpu.memory_space<vmem>>, vector<1x1x1xf32>
      %39 = vector.shape_cast %38 : vector<1x1x1xf32> to vector<1x1xf32>
      %40 = vector.shape_cast %37 : vector<1x1xf32> to vector<1x1x1xf32>
      tpu.vector_store %arg6[%c0_18, %c0_19, %c0_20], %40 {strides = array<i32>} : memref<1x1x1xf32, #tpu.memory_space<vmem>>, vector<1x1x1xf32>,
    } else {
    }
    %c0_i32_6 = arith.constant 0 : i32
    %18 = arith.cmpi eq, %arg1, %c0_i32_6 : i32
    %19 = arith.extui %18 : i1 to i32
    %c0_i32_7 = arith.constant 0 : i32
    %20 = arith.cmpi ne, %19, %c0_i32_7 : i32
    scf.if %20 {
      %c0_9 = arith.constant 0 : index
      %c0_10 = arith.constant 0 : index
      %24 = vector.load %arg9[%c0_9, %c0_10] : memref<8x128xf32, #tpu.memory_space<vmem>>, vector<8x128xf32>
      %c0_11 = arith.constant 0 : index
      %c0_12 = arith.constant 0 : index
      %25 = vector.load %arg8[%c0_11, %c0_12] : memref<8x128xf32, #tpu.memory_space<vmem>>, vector<8x128xf32>
      %26 = arith.subf %24, %25 : vector<8x128xf32>
      %27 = arith.mulf %26, %10 : vector<8x128xf32>
      %cst_13 = arith.constant dense<0.000000e+00> : vector<8xf32>
      %28 = vector.multi_reduction <add>, %27, %cst_13 [1] : vector<8x128xf32> to vector<8xf32>
      %29 = vector.shape_cast %28 : vector<8xf32> to vector<8x1xf32>
      %30 = arith.subf %14, %29 : vector<8x1xf32>
      %c0_14 = arith.constant 0 : index
      %c0_15 = arith.constant 0 : index
      %c0_16 = arith.constant 0 : index
      %31 = vector.load %arg6[%c0_14, %c0_15, %c0_16] : memref<1x1x1xf32, #tpu.memory_space<vmem>>, vector<1x1x1xf32>
      %32 = vector.shape_cast %31 : vector<1x1x1xf32> to vector<1x1xf32>
      %cst_17 = arith.constant dense<0.000000e+00> : vector<1xf32>
      %33 = vector.multi_reduction <add>, %30, %cst_17 [0] : vector<8x1xf32> to vector<1xf32>
      %34 = vector.shape_cast %33 : vector<1xf32> to vector<1x1xf32>
      %cst_18 = arith.constant 1.250000e-01 : f32
      %35 = vector.broadcast %cst_18 : f32 to vector<1x1xf32>
      %36 = arith.mulf %34, %35 : vector<1x1xf32>
      %37 = arith.addf %32, %36 : vector<1x1xf32>
      %c0_19 = arith.constant 0 : index
      %c0_20 = arith.constant 0 : index
      %c0_21 = arith.constant 0 : index
      %38 = vector.load %arg6[%c0_19, %c0_20, %c0_21] : memref<1x1x1xf32, #tpu.memory_space<vmem>>, vector<1x1x1xf32>
      %39 = vector.shape_cast %38 : vector<1x1x1xf32> to vector<1x1xf32>
      %40 = vector.shape_cast %37 : vector<1x1xf32> to vector<1x1x1xf32>
      tpu.vector_store %arg6[%c0_19, %c0_20, %c0_21], %40 {strides = array<i32>} : memref<1x1x1xf32, #tpu.memory_space<vmem>>, vector<1x1x1xf32>,
    } else {
    }
    %c1_i32 = arith.constant 1 : i32
    %21 = arith.cmpi eq, %arg1, %c1_i32 : i32
    %22 = arith.extui %21 : i1 to i32
    %c0_i32_8 = arith.constant 0 : i32
    %23 = arith.cmpi ne, %22, %c0_i32_8 : i32
    scf.if %23 {
      %c0_9 = arith.constant 0 : index
      %c0_10 = arith.constant 0 : index
      %24 = vector.load %arg8[%c0_9, %c0_10] : memref<8x128xf32, #tpu.memory_space<vmem>>, vector<8x128xf32>
      %25 = arith.mulf %24, %10 : vector<8x128xf32>
      %cst_11 = arith.constant dense<0.000000e+00> : vector<8xf32>
      %26 = vector.multi_reduction <add>, %25, %cst_11 [1] : vector<8x128xf32> to vector<8xf32>
      %27 = vector.shape_cast %26 : vector<8xf32> to vector<8x1xf32>
      %28 = arith.subf %14, %27 : vector<8x1xf32>
      %c0_12 = arith.constant 0 : index
      %c0_13 = arith.constant 0 : index
      %c0_14 = arith.constant 0 : index
      %29 = vector.load %arg6[%c0_12, %c0_13, %c0_14] : memref<1x1x1xf32, #tpu.memory_space<vmem>>, vector<1x1x1xf32>
      %30 = vector.shape_cast %29 : vector<1x1x1xf32> to vector<1x1xf32>
      %cst_15 = arith.constant dense<0.000000e+00> : vector<1xf32>
      %31 = vector.multi_reduction <add>, %28, %cst_15 [0] : vector<8x1xf32> to vector<1xf32>
      %32 = vector.shape_cast %31 : vector<1xf32> to vector<1x1xf32>
      %cst_16 = arith.constant 1.250000e-01 : f32
      %33 = vector.broadcast %cst_16 : f32 to vector<1x1xf32>
      %34 = arith.mulf %32, %33 : vector<1x1xf32>
      %35 = arith.addf %30, %34 : vector<1x1xf32>
      %c0_17 = arith.constant 0 : index
      %c0_18 = arith.constant 0 : index
      %c0_19 = arith.constant 0 : index
      %36 = vector.load %arg6[%c0_17, %c0_18, %c0_19] : memref<1x1x1xf32, #tpu.memory_space<vmem>>, vector<1x1x1xf32>
      %37 = vector.shape_cast %36 : vector<1x1x1xf32> to vector<1x1xf32>
      %38 = vector.shape_cast %35 : vector<1x1xf32> to vector<1x1x1xf32>
      tpu.vector_store %arg6[%c0_17, %c0_18, %c0_19], %38 {strides = array<i32>} : memref<1x1x1xf32, #tpu.memory_space<vmem>>, vector<1x1x1xf32>,
    } else {
    }
    return
  }
  func.func @transform_0(%arg0: i32, %arg1: i32) -> i32 {
    %c0_i32 = arith.constant 0 : i32
    %c0_i32_0 = arith.constant 0 : i32
    return %c0_i32 : i32
  }
  func.func @transform_1(%arg0: i32, %arg1: i32) -> (i32, i32, i32) {
    %c0_i32 = arith.constant 0 : i32
    %c0_i32_0 = arith.constant 0 : i32
    return %arg1, %arg0, %c0_i32 : i32, i32, i32
  }
  func.func @transform_2(%arg0: i32, %arg1: i32) -> (i32, i32, i32) {
    %c0_i32 = arith.constant 0 : i32
    %c0_i32_0 = arith.constant 0 : i32
    %c0_i32_1 = arith.constant 0 : i32
    return %c0_i32, %arg0, %c0_i32_0 : i32, i32, i32
  }
  func.func @transform_3(%arg0: i32, %arg1: i32) -> (i32, i32) {
    %c0_i32 = arith.constant 0 : i32
    %c0_i32_0 = arith.constant 0 : i32
    %c0_i32_1 = arith.constant 0 : i32
    return %c0_i32, %c0_i32_0 : i32, i32
  }
  func.func @transform_4(%arg0: i32, %arg1: i32) -> (i32, i32, i32) {
    %c0_i32 = arith.constant 0 : i32
    %c0_i32_0 = arith.constant 0 : i32
    %c0_i32_1 = arith.constant 0 : i32
    return %arg0, %c0_i32, %c0_i32_0 : i32, i32, i32
  }
  func.func @transform_5(%arg0: i32, %arg1: i32) -> (i32, i32, i32) {
    %c0_i32 = arith.constant 0 : i32
    %c0_i32_0 = arith.constant 0 : i32
    %c0_i32_1 = arith.constant 0 : i32
    return %arg0, %c0_i32, %c0_i32_0 : i32, i32, i32
  }
}

</mosaic_0001>

<bundles_post_ra>
// kernel: _dino_loss_fwd.1
= control target key start
LH: loop header
LB: loop body
LE: loop exit
PB: predicated region body
PF: predicated region fallthrough
CT: control target
= control target key end

     0   :  { %s1236_s0 = inlined_call_operand.<no memory space> [shape: f32[1], index: 0, kind: input, shape index: {}]   ;;  %s1237_s1 = inlined_call_operand.hbm [shape: f32[4,8,128], index: 1, kind: input, shape index: {}]   ;;  %s1238_s2 = inlined_call_operand.hbm [shape: f32[2,8,128], index: 2, kind: input, shape index: {}]   ;;  %s1239_s3 = inlined_call_operand.hbm [shape: f32[1,128], index: 3, kind: input, shape index: {}]   ;;  %s1240_s4 = inlined_call_operand.hbm [shape: f32[1,1,1], index: 4, kind: output, shape index: {0}]   ;;  %s1241_s5 = inlined_call_operand.hbm [shape: f32[1,1,128], index: 5, kind: output, shape index: {1}]  }
   0x1   :  { %11 = sst [smem:[#allocation4]] %s1236_s0 }
   0x2   :  { %12 = vsyncpa [#allocation6], 0 }
   0x3   :  { %14 = vsyncpa [#allocation6 + $0x1], 0 }
   0x4   :  { %15 = vsyncpa [#allocation9], 0 }
   0x5   :  { %16 = vsyncpa [#allocation7], 0 }
   0x6   :  { %17 = vsyncpa [#allocation13], 0  ;;  %s978_s20 = smov 0   ;;  %s980_s21 = smov 0  }
   0x7   :  { %s982_s22 = smov 0   ;;  %s984_s23 = smov 0  }
   0x8   :  { %s986_s24 = smov 0   ;;  %s988_s25 = smov 0  }
   0x9 LB: > { %s596_s0 = sadd.s32 4294967295, %s933_s25   ;;  %p78_p0 = scmp.ne.s32.totalorder %s917_s21, %s913_s20  ;;  %s933_s25 = sphi %s988_s25, %s23_s25   ;;  %s929_s24 = sphi %s986_s24, %s1259_s24   ;;  %s925_s23 = sphi %s984_s23, %s1258_s23   ;;  %s921_s22 = sphi %s982_s22, %s1257_s22   ;;  %s917_s21 = sphi %s980_s21, %s1256_s21   ;;  %s913_s20 = sphi %s978_s20, %s1255_s20  }
   0xa   : > { %p1010_p1 = scmp.eq.s32.totalorder %s596_s0, 0  ;;  %p597_p2 = scmp.ge.s32.totalorder %s933_s25, 1 }
   0xb   : > { %p188_p3 = scmp.lt.s32.totalorder %s933_s25, 5  ;;  %s935_s29 = smov [#allocation8]  }
   0xc   : > { %s1246_s26 = scalar_select %p1010_p1, 1, 0 }
   0xd   : > { %p1018_p4 = por %p1010_p1, %p78_p0  ;;  %p1022_p5 = pnand %p597_p2, %p188_p3 }
   0xe   : > { %s205_s30 = sshll.u32 %s935_s29, 4  ;;  %s936_s7 = smov [#allocation10]   ;;  %s206_s30 = int_to_ptr.vmem [resolvable:$true] %s205_s30 }
   0xf   : > { %s1247_s27 = scalar_select %p1018_p4, 1, 0 }
  0x10   : > { %s1248_s28 = scalar_select %p1022_p5, 1, 0 }
  0x11   : > { %p644_p6 = pneg %p1022_p5  ;;  %s219_s8 = sshll.u32 %s936_s7, 4  ;;  %s1034_s8 = int_to_ptr.vmem [resolvable:$true] %s219_s8 }
  0x12   : > { %s733_s11 = scalar_lea.hbm %s1238_s2, 256 }
  0x13   : > { %p1030_p7 = pnand %p644_p6, %p1010_p1  ;;  %p734_p8 = scmp.ne.s32.totalorder %s1238_s2, %s733_s11 }
  0x14   : > { %p740_p12 = scmp.lt.u32.totalorder %s733_s11, %s1238_s2 }
  0x15   : > { %p735_p9 = pneg %p1030_p7 }
  0x17   : > { %p736_p10 = pnand %p735_p9, %p734_p8 }
  0x19   : > { %p737_p11 = pneg %p736_p10 }
  0x1b   : > { %p742_p13 = pnand %p740_p12, %p737_p11 }
  0x1d   : > { %745 = shalt.err (!%p742_p13)
}
  0x1e   : > { %s746_s16 = scalar_lea.vmem %s206_s30, 256  ;;  %p754_p6 = scmp.lt.s32.totalorder %s206_s30, %s206_s30 }
  0x1f   : > { %p747_p0 = scmp.ne.s32.totalorder %s206_s30, %s746_s16  ;;  %p755_p1 = scmp.lt.s32.totalorder %s746_s16, %s746_s16 }
  0x21   : > { %p749_p2 = pnand %p747_p0, %p735_p9  ;;  %p756_p4 = por %p755_p1, %p754_p6 }
  0x23   : > { %p750_p3 = pneg %p749_p2 }
  0x25   : > { %p757_p5 = pnand %p756_p4, %p750_p3 }
  0x27   : > { %760 = shalt.err (!%p757_p5)
}
  0x28   : > { %s937_s17 = smov 128   ;;  %s938_s18 = smov 8  }
  0x29   : > { %647 = dma.hbm_to_vmem [thread:$0]  (!%p1030_p7), %s1238_s2, 256, %s206_s30, [#allocation9], %s937_s17, %s937_s17, %s938_s18  }
  0x2a   : > { %s761_s9 = scalar_lea.hbm %s1239_s3, 16 }
  0x2b   : > { %p762_p8 = scmp.ne.s32.totalorder %s1239_s3, %s761_s9  ;;  %p768_p5 = scmp.lt.u32.totalorder %s761_s9, %s1239_s3 }
  0x2d   : > { %p764_p1 = pnand %p762_p8, %p735_p9 }
  0x2f   : > { %p765_p4 = pneg %p764_p1 }
  0x31   : > { %p770_p10 = pnand %p768_p5, %p765_p4 }
  0x33   : > { %773 = shalt.err (!%p770_p10)
}
  0x34   : > { %s774_s30 = scalar_lea.vmem %s1034_s8, 16  ;;  %s781_s14 = scalar_lea.vmem %s1034_s8, 32 }
  0x35   : > { %p775_p11 = scmp.ne.s32.totalorder %s1034_s8, %s774_s30  ;;  %p782_p0 = scmp.lt.s32.totalorder %s1034_s8, %s1034_s8 }
  0x36   : > { %p783_p2 = scmp.lt.s32.totalorder %s781_s14, %s774_s30 }
  0x37   : > { %p777_p12 = pnand %p775_p11, %p735_p9 }
  0x38   : > { %p784_p3 = por %p783_p2, %p782_p0 }
  0x39   : > { %p778_p13 = pneg %p777_p12 }
  0x3b   : > { %p785_p6 = pnand %p784_p3, %p778_p13 }
  0x3d   : > { %788 = shalt.err (!%p785_p6)
}
  0x3e   : > { %650 = dma.hbm_to_vmem [thread:$0]  (!%p1030_p7), %s1239_s3, 16, %s1034_s8, [#allocation9]  }
  0x3f   : > { %s32_s17 = sadd.s32 1, %s929_s24  ;;  %s65_s18 = sadd.s32 1, %s921_s22 }
  0x40   : > { %p33_p9 = scmp.ge.s32.totalorder %s32_s17, 4  ;;  %p72_p8 = scmp.ne.s32.totalorder %s921_s22, %s917_s21 }
  0x41   : > { %p73_p1 = scmp.eq.s32.totalorder %s933_s25, 0  ;;  %p657_p4 = scmp.lt.s32.totalorder %s933_s25, 4 }
  0x42   : > { %s1261_s17 = smov (%p33_p9, %s32_s17), 0  ;;  %s230_s6 = sand.u32 1, %s921_s22  }
  0x43   : > { %p74_p5 = por %p73_p1, %p72_p8  ;;  %s60_s19 = ssub.s32 %s929_s24, %s1261_s17 }
  0x44   : > { %p63_p10 = scmp.eq.s32.totalorder %s60_s19, 0  ;;  %s601_s20 = sshll.u32 %s230_s6, 3 }
  0x45   : > { %s602_s29 = sshll.u32 %s929_s24, 7  ;;  %s234_s11 = scalar_lea.vmem [#allocation5], %s601_s20 }
  0x46   : > { %s1097_s7 = scalar_select %p63_p10, %s921_s22, %s65_s18  }
  0x47   : > { %s1102_s10 = scalar_lea.hbm %s1237_s1, %s602_s29  ;;  %s242_s12 = sshll.u32 %s234_s11, 4  ;;  %s1104_s12 = int_to_ptr.vmem [resolvable:$true] %s242_s12 }
  0x48   : > { %p1108_p7 = pnand %p657_p4, %p74_p5  ;;  %s231_s30 = scalar_lea.sflag [#allocation6], %s230_s6 }
  0x49   : > { %s789_s14 = scalar_lea.hbm %s1102_s10, 128  ;;  %s794_s18 = scalar_lea.hbm %s1237_s1, 512 }
  0x4a   : > { %p790_p11 = scmp.ne.s32.totalorder %s1102_s10, %s789_s14  ;;  %p791_p12 = pneg %p1108_p7 }
  0x4b   : > { %p795_p2 = scmp.lt.u32.totalorder %s1102_s10, %s1237_s1  ;;  %p796_p3 = scmp.lt.u32.totalorder %s794_s18, %s789_s14 }
  0x4c   : > { %p792_p13 = pnand %p791_p12, %p790_p11  ;;  %p798_p9 = scmp.lt.u32.totalorder %s789_s14, %s1102_s10 }
  0x4d   : > { %p797_p6 = por %p796_p3, %p795_p2 }
  0x4e   : > { %p793_p0 = pneg %p792_p13 }
  0x4f   : > { %p799_p8 = por %p798_p9, %p797_p6 }
  0x51   : > { %p800_p1 = pnand %p799_p8, %p793_p0 }
  0x53   : > { %803 = shalt.err (!%p800_p1)
}
  0x54   : > { %s804_s6 = scalar_lea.vmem %s1104_s12, 128  ;;  %s939_s29 = smov [#allocation5]  }
  0x55   : > { %p805_p4 = scmp.ne.s32.totalorder %s1104_s12, %s804_s6  ;;  %s809_s9 = sshll.u32 %s939_s29, 4  ;;  %s810_s9 = int_to_ptr.vmem [resolvable:$false] %s809_s9 }
  0x56   : > { %s811_s8 = scalar_lea.vmem %s810_s9, 256  ;;  %p812_p11 = scmp.lt.s32.totalorder %s1104_s12, %s810_s9 }
  0x57   : > { %p807_p5 = pnand %p805_p4, %p791_p12  ;;  %p813_p13 = scmp.lt.s32.totalorder %s811_s8, %s804_s6 }
  0x59   : > { %p808_p10 = pneg %p807_p5  ;;  %p814_p2 = por %p813_p13, %p812_p11 }
  0x5b   : > { %p815_p3 = pnand %p814_p2, %p808_p10 }
  0x5d   : > { %818 = shalt.err (!%p815_p3)
}
  0x5e   : > { %654 = dma.hbm_to_vmem [thread:$0]  (!%p1108_p7), %s1102_s10, 128, %s1104_s12, %s231_s30  }
  0x5f   : > { %p1251_p0 = scmp.ne.s32.totalorder %s1248_s28, 0 }
  0x60   : > { %s253_s11 = sand.u32 (!%p1251_p0), 1, %s917_s21   ;;  %p1252_p12 = scmp.ne.s32.totalorder (!%p1251_p0), %s1247_s27, 0 }
  0x61   : > { %251 = sbr.rel (%p1251_p0) target bundleno = 1152 (0x480), region = 36  ;;  %s1140_s14 = sshll.u32 (!%p1251_p0), %s253_s11, 3 }
  0x62   : > { %s254_s15 = scalar_lea.sflag (!%p1251_p0), [#allocation6], %s253_s11  ;;  %s257_s16 = scalar_lea.vmem (!%p1251_p0), [#allocation5], %s1140_s14 }
  0x68   : > { %896 = dma.done.wait (%p1252_p12), %s254_s15, 128  }
  0x69   : > { %898 = vsyncadd (%p1252_p12), %s254_s15, 4294967168  ;;  %p1253_p6 = scmp.ne.s32.totalorder %s1246_s26, 0 }
  0x6b   : > { %900 = dma.done.wait (%p1253_p6), [#allocation9], 272  }
  0x6c   : > { %902 = vsyncadd (%p1253_p6), [#allocation9], 4294967024  ;;  %p607_p7 = scmp.ne.s32.totalorder %s925_s23, 0 }
  0x6d   : > { %v291_v0 = vld [vmem:[#allocation8] sm:$0xff] (!%p607_p7)  ;;  %v608_v1 = vld [vmem:[#allocation10] ss:$0 sm:$0xff] (!%p607_p7)  ;;  %s294_s28 = sld [smem:[#allocation4]] (!%p607_p7)  ;;  %v292_v2 = vld [vmem:[#allocation8 + $0x8] sm:$0xff] (!%p607_p7)  ;;  %vm403_vm0 = vcmask (!%p607_p7), 0  }
  0x6e   : > { %290 = sbr.rel (%p607_p7) target bundleno = 437 (0x1b5), region = 52  ;;  %v940_v3 = vmov (!%p607_p7), 0.0   ;;  %v327_v4 = vadd.f32 (!%p607_p7), %v292_v2, %v291_v0  ;;  %vm328_vm1 = vcmask (!%p607_p7), 64512   ;;  %v301_v5 = vsub.f32 (!%p607_p7), %v291_v0, %v608_v1 }
  0x6f   : > { %621 = vmatprep.subr.mxu0 (!%p607_p7), %v940_v3  ;;  %404 = vst.msk [vmem:[#allocation11] sm:$0x1] (!%p607_p7), %vm403_vm0, %v940_v3  ;;  %vm941_vm2 = vmmov (!%p607_p7), 0   ;;  %v302_v6 = vsub.f32 (!%p607_p7), %v292_v2, %v608_v1  ;;  %v942_v7 = vmov (!%p607_p7), 1.0  }
  0x70   : > { %623 = vmatprep.mubr.msk.f32.mxu0 (!%p607_p7), %vm941_vm2, %v940_v3  ;;  %622 = vmatpush3.msra.mxu0 (!%p607_p7), %v327_v4 }
  0x71   : > { %624 = vmatmul.mubr.msk.f32.vlgmr.msra.gmra.mrb[0].mxu0 (!%p607_p7), %vm328_vm1, %v942_v7 }
  0x73   : > { %v303_v8 = vstv (!%p607_p7), %s294_s28 }
  0x74   : > { %v304_v9 = vmul.f32 (!%p607_p7), %v303_v8, %v301_v5  ;;  %v305_v10 = vmul.f32 (!%p607_p7), %v303_v8, %v302_v6 }
  0x76   : > { %306 = vmax.xlane.f32.xlu0 %v304_v9 }
  0x7a   : > { %308 = vmax.xlane.f32.xlu0 %v305_v10 }
 0x103   : > { %v307_v11 = vpop.xlane.xlu0 %306 }
 0x104   : > { %v310_v12 = vsub.f32 %v304_v9, %v307_v11 }
 0x106   : > { %v312_v13 = vmul.f32 1.442695, %v310_v12 }
 0x107   : > { %v309_v14 = vpop.xlane.xlu0 %308 }
 0x108   : > { %721 = vpow2.f32 %v312_v13  ;;  %v311_v15 = vsub.f32 %v305_v10, %v309_v14 }
 0x10a   : > { %v314_v16 = vmul.f32 1.442695, %v311_v15 }
 0x10c   : > { %723 = vpow2.f32 %v314_v16 }
 0x112   : > { %v722_v17 = vpop.eup %721 }
 0x113   : > { %316 = vadd.xlane.f32.xlu1 %v722_v17 }
 0x116   : > { %v724_v18 = vpop.eup %723 }
 0x117   : > { %318 = vadd.xlane.f32.xlu1 %v724_v18 }
 0x144   : > { %v398_v19 = vpop.f32.mrb[0].mxu0 }
 0x145   : > { %402 = vst [vmem:[#allocation12] sm:$0x1] %v398_v19  ;;  %v625_v20 = vpop.f32.mrb[1].mxu0 }
 0x1a0   : > { %v317_v21 = vpop.xlane.xlu1 %316 }
 0x1a1   : > { %725 = vrcp.f32 %v317_v21 }
 0x1a4   : > { %v319_v22 = vpop.xlane.xlu1 %318 }
 0x1a5   : > { %727 = vrcp.f32 %v319_v22 }
 0x1ab   : > { %v726_v23 = vpop.eup %725 }
 0x1ac   : > { %v322_v24 = vmul.f32 %v726_v23, %v722_v17 }
 0x1ae   : > { %324 = vst [vmem:[#allocation2] sm:$0xff] %v322_v24 }
 0x1af   : > { %v728_v25 = vpop.eup %727 }
 0x1b0   : > { %v323_v26 = vmul.f32 %v728_v25, %v724_v18 }
 0x1b2   : > { %v325_v27 = vadd.f32 %v323_v26, %v322_v24 }
 0x1b4   : > { %326 = vst [vmem:[#allocation3] sm:$0xff] %v325_v27 }
 0x1b5 PF: > { %v405_v28 = vld [vmem:[%s257_s16] sm:$0xff]  ;;  %p610_p9 = scmp.lt.s32.totalorder %s925_s23, 2 }
 0x1b6   : > { %v406_v29 = vmul.f32 10.0, %v405_v28  ;;  %v426_v48 = vld [vmem:[#allocation11] sm:$0x1] (!%p610_p9)  ;;  %vm435_vm3 = vcmask (!%p610_p9), 0  }
 0x1b8   : > { %407 = vmax.xlane.f32.xlu0 %v406_v29 }
 0x1bb   : > { %v421_v37 = vld [vmem:[#allocation3] sm:$0xff] (!%p610_p9) }
 0x245   : > { %v408_v30 = vpop.xlane.xlu0 %407 }
 0x246   : > { %v409_v31 = vsub.f32 %v406_v29, %v408_v30 }
 0x248   : > { %v410_v32 = vmul.f32 1.442695, %v409_v31  ;;  %v422_v38 = vmul.f32 (!%p610_p9), %v421_v37, %v409_v31 }
 0x24a   : > { %729 = vpow2.f32 %v410_v32 }
 0x254   : > { %v730_v33 = vpop.eup %729 }
 0x255   : > { %412 = vadd.xlane.f32.xlu0 %v730_v33 }
 0x259   : > { %423 = vadd.xlane.f32.xlu0 (!%p610_p9), %v422_v38 }
 0x2e2   : > { %v413_v34 = vpop.xlane.xlu0 %412 }
 0x2e3   : > { %731 = vlog2.f32 %v413_v34 }
 0x2e6   : > { %v424_v40 = vpop.xlane.xlu0 (!%p610_p9), %423 }
 0x2e8   : > { %419 = sbr.rel (%p610_p9) target bundleno = 773 (0x305), region = 56 }
 0x2ed   : > { %v732_v35 = vpop.eup %731 }
 0x2ee   : > { %v415_v36 = vmul.f32 0.6931472, %v732_v35 }
 0x2f0   : > { %v420_v39 = vmul.f32 2.0, %v415_v36 }
 0x2f2   : > { %v425_v41 = vsub.f32 %v420_v39, %v424_v40 }
 0x2f4   : > { %v427_v42 = vrot.slane %v425_v41, 4 }
 0x2f6   : > { %v428_v43 = vadd.f32 %v427_v42, %v425_v41 }
 0x2f8   : > { %v429_v44 = vrot.slane %v428_v43, 2 }
 0x2fa   : > { %v430_v45 = vadd.f32 %v429_v44, %v428_v43 }
 0x2fc   : > { %v431_v46 = vrot.slane %v430_v45, 1 }
 0x2fe   : > { %v432_v47 = vadd.f32 %v431_v46, %v430_v45 }
 0x300   : > { %v433_v49 = vmul.f32 0.125, %v432_v47 }
 0x302   : > { %v434_v50 = vadd.f32 %v433_v49, %v426_v48 }
 0x304   : > { %436 = vst.msk [vmem:[#allocation11] sm:$0x1] %vm435_vm3, %v434_v50 }
 0x305 PF: > { %439 = sbr.rel (%p607_p7) target bundleno = 939 (0x3ab), region = 60  ;;  %v440_v51 = vld [vmem:[#allocation3] sm:$0xff] (!%p607_p7)  ;;  %v441_v52 = vld [vmem:[#allocation2] sm:$0xff] (!%p607_p7)  ;;  %vm456_vm4 = vcmask (!%p607_p7), 0  }
 0x306   : > { %v442_v53 = vsub.f32 (!%p607_p7), %v440_v51, %v441_v52 }
 0x308   : > { %v443_v54 = vmul.f32 (!%p607_p7), %v442_v53, %v409_v31 }
 0x30a   : > { %444 = vadd.xlane.f32.xlu0 (!%p607_p7), %v443_v54 }
 0x30b   : > { %v447_v63 = vld [vmem:[#allocation11] sm:$0x1] (!%p607_p7) }
 0x397   : > { %v445_v55 = vpop.xlane.xlu0 %444 }
 0x398   : > { %v446_v56 = vsub.f32 %v415_v36, %v445_v55 }
 0x39a   : > { %v448_v57 = vrot.slane %v446_v56, 4 }
 0x39c   : > { %v449_v58 = vadd.f32 %v448_v57, %v446_v56 }
 0x39e   : > { %v450_v59 = vrot.slane %v449_v58, 2 }
 0x3a0   : > { %v451_v60 = vadd.f32 %v450_v59, %v449_v58 }
 0x3a2   : > { %v452_v61 = vrot.slane %v451_v60, 1 }
 0x3a4   : > { %v453_v62 = vadd.f32 %v452_v61, %v451_v60 }
 0x3a6   : > { %v454_v0 = vmul.f32 0.125, %v453_v62 }
 0x3a8   : > { %v455_v1 = vadd.f32 %v454_v0, %v447_v63 }
 0x3aa   : > { %457 = vst.msk [vmem:[#allocation11] sm:$0x1] %vm456_vm4, %v455_v1 }
 0x3ab PF: > { %p612_p8 = scmp.ne.s32.totalorder %s925_s23, 1 }
 0x3ac   : > { %v462_v2 = vld [vmem:[#allocation2] sm:$0xff] (!%p612_p8)  ;;  %vm476_vm5 = vcmask (!%p612_p8), 0  }
 0x3ad   : > { %461 = sbr.rel (%p612_p8) target bundleno = 1104 (0x450), region = 64  ;;  %v463_v3 = vmul.f32 (!%p612_p8), %v462_v2, %v409_v31 }
 0x3af   : > { %464 = vadd.xlane.f32.xlu0 (!%p612_p8), %v463_v3 }
 0x3b1   : > { %v467_v12 = vld [vmem:[#allocation11] sm:$0x1] (!%p612_p8) }
 0x43c   : > { %v465_v4 = vpop.xlane.xlu0 %464 }
 0x43d   : > { %v466_v5 = vsub.f32 %v415_v36, %v465_v4 }
 0x43f   : > { %v468_v6 = vrot.slane %v466_v5, 4 }
 0x441   : > { %v469_v7 = vadd.f32 %v468_v6, %v466_v5 }
 0x443   : > { %v470_v8 = vrot.slane %v469_v7, 2 }
 0x445   : > { %v471_v9 = vadd.f32 %v470_v8, %v469_v7 }
 0x447   : > { %v472_v10 = vrot.slane %v471_v9, 1 }
 0x449   : > { %v473_v11 = vadd.f32 %v472_v10, %v471_v9 }
 0x44b   : > { %v474_v13 = vmul.f32 0.125, %v473_v11 }
 0x44d   : > { %v475_v14 = vadd.f32 %v474_v13, %v467_v12 }
 0x44f   : > { %477 = vst.msk [vmem:[#allocation11] sm:$0x1] %vm476_vm5, %v475_v14 }
 0x450 PF: > { %p1162_p1 = scmp.eq.s32.totalorder %s596_s0, 3  ;;  %s943_s26 = smov [#allocation11]  }
 0x451   : > { %s487_s27 = sshll.u32 %s943_s26, 4  ;;  %s944_s10 = smov [#allocation12]   ;;  %s488_s27 = int_to_ptr.vmem [resolvable:$true] %s487_s27 }
 0x452   : > { %s500_s12 = sshll.u32 %s944_s10, 4  ;;  %s819_s13 = scalar_lea.vmem %s488_s27, 16  ;;  %s1166_s12 = int_to_ptr.vmem [resolvable:$true] %s500_s12 }
 0x453   : > { %p820_p4 = scmp.ne.s32.totalorder %s488_s27, %s819_s13  ;;  %s825_s30 = scalar_lea.vmem %s488_s27, 32 }
 0x454   : > { %p826_p11 = scmp.lt.s32.totalorder %s488_s27, %s488_s27  ;;  %p827_p13 = scmp.lt.s32.totalorder %s825_s30, %s819_s13 }
 0x455   : > { %p821_p5 = pnand %p820_p4, %p1162_p1 }
 0x456   : > { %p828_p2 = por %p827_p13, %p826_p11 }
 0x457   : > { %p822_p10 = pneg %p821_p5 }
 0x459   : > { %p829_p3 = pnand %p828_p2, %p822_p10 }
 0x45b   : > { %832 = shalt.err (!%p829_p3)
}
 0x45c   : > { %s833_s19 = scalar_lea.hbm %s1240_s4, 16 }
 0x45d   : > { %p834_p0 = scmp.ne.s32.totalorder %s1240_s4, %s833_s19  ;;  %p839_p7 = scmp.lt.u32.totalorder %s833_s19, %s1240_s4 }
 0x45f   : > { %p835_p12 = pnand %p834_p0, %p1162_p1 }
 0x461   : > { %p836_p6 = pneg %p835_p12 }
 0x463   : > { %p841_p9 = pnand %p839_p7, %p836_p6 }
 0x465   : > { %844 = shalt.err (!%p841_p9)
}
 0x466   : > { %637 = dma.vmem_to_hbm [thread:$0]  (%p1162_p1), %s488_s27, 16, %s1240_s4, [#allocation7]  }
 0x467   : > { %s845_s14 = scalar_lea.vmem %s1166_s12, 16  ;;  %s851_s15 = scalar_lea.vmem %s1166_s12, 32 }
 0x468   : > { %p846_p8 = scmp.ne.s32.totalorder %s1166_s12, %s845_s14  ;;  %p852_p10 = scmp.lt.s32.totalorder %s1166_s12, %s1166_s12 }
 0x469   : > { %p853_p11 = scmp.lt.s32.totalorder %s851_s15, %s845_s14 }
 0x46a   : > { %p847_p4 = pnand %p846_p8, %p1162_p1 }
 0x46b   : > { %p854_p13 = por %p853_p11, %p852_p10 }
 0x46c   : > { %p848_p5 = pneg %p847_p4 }
 0x46e   : > { %p855_p2 = pnand %p854_p13, %p848_p5 }
 0x470   : > { %858 = shalt.err (!%p855_p2)
}
 0x471   : > { %s859_s26 = scalar_lea.hbm %s1241_s5, 16 }
 0x472   : > { %p860_p3 = scmp.ne.s32.totalorder %s1241_s5, %s859_s26  ;;  %p865_p6 = scmp.lt.u32.totalorder %s859_s26, %s1241_s5 }
 0x474   : > { %p861_p0 = pnand %p860_p3, %p1162_p1 }
 0x476   : > { %p862_p12 = pneg %p861_p0 }
 0x478   : > { %p867_p7 = pnand %p865_p6, %p862_p12 }
 0x47a   : > { %870 = shalt.err (!%p867_p7)
}
 0x47b   : > { %639 = dma.vmem_to_hbm [thread:$0]  (%p1162_p1), %s1166_s12, 16, %s1241_s5, [#allocation13]  }
 0x47c   : > { %904 = dma.done.wait (%p1162_p1), [#allocation7], 16  }
 0x47d   : > { %906 = vsyncadd (%p1162_p1), [#allocation7], 4294967280 }
 0x47e   : > { %908 = dma.done.wait (%p1162_p1), [#allocation13], 16  }
 0x47f   : > { %910 = vsyncadd (%p1162_p1), [#allocation13], 4294967280 }
 0x480 PF: > { %s23_s25 = sadd.s32 1, %s933_s25   ;;  %s1255_s20 = smov %s917_s21 }
 0x481   : > { %p20_p9 = scmp.ge.s32.totalorder %s23_s25, 6   ;;  %s1256_s21 = smov %s921_s22 }
 0x482   : > { %s1257_s22 = smov %s1097_s7  ;;  %s1258_s23 = smov %s929_s24 }
 0x483   : > { %s1259_s24 = smov %s1261_s17  ;;  %22 = sbr.rel (!%p20_p9) target bundleno = 9 (0x9), region = 108 }
 0x48a   :  { %517 = vsyncpa [#allocation6], 1 }
 0x48b   :  { %519 = vsyncpa [#allocation6 + $0x1], 1 }
 0x48c   :  { %520 = vsyncpa [#allocation9], 1 }
 0x48d   :  { %521 = vsyncpa [#allocation7], 1 }
 0x48e   :  { %523 = vsyncpa [#allocation7 + $0x1], 1 }
 0x48f   :  { %524 = vsyncpa [#allocation13], 1 }

</bundles_post_ra>
